<compile_context>
chip_gen: v6e
topology: v6e:2x2x1
jax: 0.10.0
libtpu: 0.0.40
codegen_flags: <defaults>
</compile_context>

<pallas_src>
import jax
import jax.numpy as jnp
from jax import lax
from jax.experimental import pallas as pl
from jax.experimental.pallas import tpu as pltpu


def _round_up(x: int, m: int) -> int:
    return ((x + m - 1) // m) * m


def _make_mlp_mean_kernel(n_layers: int):
    """Kernel closed over the (static) number of hidden layers. Computes mean^T only."""

    def kernel(*refs):
        # refs = [obs_tile, (W, b) * n_layers, W_out, b_out, mean_t_tile]
        obs_ref = refs[0]
        param_refs = refs[1:1 + 2 * (n_layers + 1)]
        out_ref = refs[-1]

        x = obs_ref[...].astype(jnp.float32)          # [TB, ob_dim], batch-major

        for layer in range(n_layers + 1):
            w = param_refs[2 * layer][...]            # [out, in]  (torch layout)
            b = param_refs[2 * layer + 1][...]        # [out, 1]
            if layer == 0:
                # Fold obs^T into the matmul: contract the `in` dims of both operands
                # -> [out, TB] feature-major activations (MXU handles the transposed RHS).
                x = lax.dot_general(w, x, (((1,), (1,)), ((), ())),
                                    preferred_element_type=jnp.float32) + b
            else:
                x = jnp.dot(w, x, preferred_element_type=jnp.float32) + b
            if layer < n_layers:                      # hidden layers: tanh; output: identity
                x = jnp.tanh(x)

        out_ref[...] = x.astype(out_ref.dtype)        # [ac_dim, TB], lane-dense store

    return kernel


def mlp_policy_forward(obs, layer_params, logstd, *, n_layers,
                       block_b=4096, obs_bf16=False):
    """Pallas wrapper. Returns (mean, sigma) of the Normal action distribution.

    obs          : [B, ob_dim] float32
    layer_params : flat list [W1, b1, ..., Wn, bn, W_out, b_out]
                   with W_k shaped [out, in] (torch Linear.weight layout), b_k [out, 1]
    logstd       : [1, ac_dim] float32
    Returns mean [B, ac_dim] and sigma [1, ac_dim] (sigma broadcasts against mean,
    exactly like torch's logstd.exp().expand_as(mean) view).
    """
    B, ob_dim = obs.shape
    ac_dim = logstd.shape[-1]

    if obs_bf16:
        # Halves the dominant HBM stream (obs); in-kernel math stays f32.
        obs = obs.astype(jnp.bfloat16)

    # Batch tile: big enough to amortize per-grid-step overhead, small enough that the
    # lane-padded obs tiles (TB*128*4 B, x2 pipeline buffers) stay well under v7x's
    # 32 MiB scoped VMEM.  Keep >=2 grid steps for B >= 256 so both v7x TCs get work.
    block_b = max(128, _round_up(block_b, 128))
    if B > block_b:
        TB = block_b                                  # multiple of 128 -> legal lane block
    elif B >= 256:
        TB = _round_up(-(-B // 2), 128)               # two roughly equal, 128-aligned tiles
    else:
        TB = B                                        # single full-extent block (always legal)
    grid = (pl.cdiv(B, TB),)

    in_specs = [pl.BlockSpec((TB, ob_dim), lambda i: (i, 0))]
    # Weights / biases: full-array blocks, constant block index -> DMA'd once, resident.
    for p in layer_params:
        in_specs.append(pl.BlockSpec(p.shape, lambda i: (0, 0)))

    dims = [ob_dim] + [layer_params[2 * l].shape[0] for l in range(n_layers)] + [ac_dim]
    cost = pl.CostEstimate(
        flops=2 * B * sum(dims[i] * dims[i + 1] for i in range(len(dims) - 1))
        + B * sum(dims[1:]),
        transcendentals=B * sum(dims[1:-1]),
        bytes_accessed=int(obs.size) * obs.dtype.itemsize
        + B * ac_dim * 4
        + sum(int(p.size) * p.dtype.itemsize for p in layer_params),
    )

    mean_t = pl.pallas_call(
        _make_mlp_mean_kernel(n_layers),
        out_shape=jax.ShapeDtypeStruct((ac_dim, B), jnp.float32),
        grid=grid,
        in_specs=in_specs,
        out_specs=pl.BlockSpec((ac_dim, TB), lambda i: (0, i)),
        compiler_params=pltpu.CompilerParams(
            dimension_semantics=("parallel",),        # v7x: 2 TCs split the batch axis
            vmem_limit_bytes=32 * 1024 * 1024,        # budget against v7x scoped VMEM
        ),
        cost_estimate=cost,
    )(obs, *layer_params)

    # Kernel emits mean feature-major (lane-dense stores); callers that can consume the
    # transposed layout may skip this tiny [ac_dim, B] transpose.
    mean = mean_t.T

    # sigma = logstd.exp(); batch-independent, broadcast lazily (no [B, ac_dim] slab).
    sigma = jnp.exp(logstd)
    return mean, sigma


def _init_params(key, ob_dim, ac_dim, n_layers, size):
    """Deterministic init mirroring torch.nn.Linear default (U[-1/sqrt(fan_in), +]).

    Weights in torch layout [out, in]; biases [out, 1]."""
    dims = [ob_dim] + [size] * n_layers + [ac_dim]
    params = []
    for i in range(len(dims) - 1):
        fan_in, fan_out = dims[i], dims[i + 1]
        key, kw, kb = jax.random.split(key, 3)
        bound = 1.0 / (fan_in ** 0.5)
        w = jax.random.uniform(kw, (fan_out, fan_in), jnp.float32, -bound, bound)
        b = jax.random.uniform(kb, (fan_out, 1), jnp.float32, -bound, bound)
        params.extend([w, b])
    # logstd = nn.Parameter(torch.zeros(ac_dim))
    logstd = jnp.zeros((1, ac_dim), dtype=jnp.float32)
    return params, logstd


def _reference_forward(obs, layer_params, logstd, n_layers):
    x = obs
    for layer in range(n_layers + 1):
        w = layer_params[2 * layer]
        b = layer_params[2 * layer + 1]
        x = x @ w.T + b[:, 0]
        if layer < n_layers:
            x = jnp.tanh(x)
    mean = x
    sigma = jnp.broadcast_to(jnp.exp(logstd), mean.shape)
    return mean, sigma


if __name__ == "__main__":
    # Small shapes consistent with MLPPolicy(ac_dim, ob_dim, n_layers, size)
    B, ob_dim, ac_dim, n_layers, size = 8, 16, 4, 2, 32

    key = jax.random.PRNGKey(0)
    key, k_obs = jax.random.split(key)
    obs = jax.random.normal(k_obs, (B, ob_dim), dtype=jnp.float32)

    layer_params, logstd = _init_params(key, ob_dim, ac_dim, n_layers, size)

    mean, sigma = mlp_policy_forward(obs, layer_params, logstd, n_layers=n_layers)
    jax.block_until_ready((mean, sigma))

    ref_mean, ref_sigma = _reference_forward(obs, layer_params, logstd, n_layers)
    assert mean.shape == (B, ac_dim)
    assert jnp.allclose(mean, ref_mean, atol=1e-5, rtol=1e-5)
    assert jnp.allclose(jnp.broadcast_to(sigma, ref_sigma.shape), ref_sigma,
                        atol=1e-6, rtol=1e-6)

    # Multi-step grid + ragged last block (no wrapper pad/slice) + the >=2-step
    # megacore-split path (B=300 -> TB=256, grid=2).
    B2 = 300
    key, k_obs2 = jax.random.split(key)
    obs2 = jax.random.normal(k_obs2, (B2, ob_dim), dtype=jnp.float32)
    mean2, sigma2 = mlp_policy_forward(obs2, layer_params, logstd, n_layers=n_layers)
    jax.block_until_ready((mean2, sigma2))
    ref_mean2, _ = _reference_forward(obs2, layer_params, logstd, n_layers)
    assert mean2.shape == (B2, ac_dim)
    assert jnp.allclose(mean2, ref_mean2, atol=1e-5, rtol=1e-5)

    # Opt-in bf16 obs HBM stream (halves the dominant input bytes); f32 math in-kernel,
    # so only obs quantization error remains -> loose tolerance.
    mean3, _ = mlp_policy_forward(obs2, layer_params, logstd, n_layers=n_layers,
                                  obs_bf16=True)
    jax.block_until_ready(mean3)
    assert jnp.allclose(mean3, ref_mean2, atol=3e-2, rtol=3e-2)

    # TODO(synk): distributions.Normal(mean, sigma) object construction / .sample() /
    # log_prob / the Adam optimizer update have no Pallas equivalent; the kernel returns
    # the distribution parameters only.
    print("KERNEL_OK")
</pallas_src>

<mosaic_0001>
module attributes {stable_mosaic.version = 11 : i64} {
  func.func @kernel(%arg0: i32, %arg1: memref<8x16xf32, #tpu.memory_space<vmem>>, %arg2: memref<32x16xf32, #tpu.memory_space<vmem>>, %arg3: memref<32x1xf32, #tpu.memory_space<vmem>>, %arg4: memref<32x32xf32, #tpu.memory_space<vmem>>, %arg5: memref<32x1xf32, #tpu.memory_space<vmem>>, %arg6: memref<4x32xf32, #tpu.memory_space<vmem>>, %arg7: memref<4x1xf32, #tpu.memory_space<vmem>>, %arg8: memref<4x8xf32, #tpu.memory_space<vmem>>) attributes {dimension_semantics = [#tpu.dimension_semantics<parallel>], iteration_bounds = array<i64: 1>, scalar_prefetch = 0 : i64, scratch_operands = 0 : i64, tpu.core_type = #tpu.core_type<tc>, window_params = [{transform_indices = @transform_0, window_bounds = array<i64: 8, 16>}, {pipeline_mode = #tpu.pipeline_mode<synchronous>, transform_indices = @transform_1, window_bounds = array<i64: 32, 16>}, {pipeline_mode = #tpu.pipeline_mode<synchronous>, transform_indices = @transform_2, window_bounds = array<i64: 32, 1>}, {pipeline_mode = #tpu.pipeline_mode<synchronous>, transform_indices = @transform_3, window_bounds = array<i64: 32, 32>}, {pipeline_mode = #tpu.pipeline_mode<synchronous>, transform_indices = @transform_4, window_bounds = array<i64: 32, 1>}, {pipeline_mode = #tpu.pipeline_mode<synchronous>, transform_indices = @transform_5, window_bounds = array<i64: 4, 32>}, {pipeline_mode = #tpu.pipeline_mode<synchronous>, transform_indices = @transform_6, window_bounds = array<i64: 4, 1>}, {transform_indices = @transform_7, window_bounds = array<i64: 4, 8>}]} {
    %c0 = arith.constant 0 : index
    %c0_0 = arith.constant 0 : index
    %0 = vector.load %arg1[%c0, %c0_0] : memref<8x16xf32, #tpu.memory_space<vmem>>, vector<8x16xf32>
    %c0_1 = arith.constant 0 : index
    %c0_2 = arith.constant 0 : index
    %1 = vector.load %arg2[%c0_1, %c0_2] : memref<32x16xf32, #tpu.memory_space<vmem>>, vector<32x16xf32>
    %c0_3 = arith.constant 0 : index
    %c0_4 = arith.constant 0 : index
    %2 = vector.load %arg3[%c0_3, %c0_4] : memref<32x1xf32, #tpu.memory_space<vmem>>, vector<32x1xf32>
    %cst = arith.constant dense<0.000000e+00> : vector<32x8xf32>
    %3 = tpu.matmul %1, %0, %cst {dimension_numbers = #tpu.dot_dimension_numbers<[1], [1], [0], [0], [0, 0, 1, 0], [], []>} : vector<32x16xf32>, vector<8x16xf32>, vector<32x8xf32> -> vector<32x8xf32>
    %4 = vector.broadcast %2 : vector<32x1xf32> to vector<32x8xf32>
    %5 = arith.addf %3, %4 : vector<32x8xf32>
    %6 = math.tanh %5 : vector<32x8xf32>
    %c0_5 = arith.constant 0 : index
    %c0_6 = arith.constant 0 : index
    %7 = vector.load %arg4[%c0_5, %c0_6] : memref<32x32xf32, #tpu.memory_space<vmem>>, vector<32x32xf32>
    %c0_7 = arith.constant 0 : index
    %c0_8 = arith.constant 0 : index
    %8 = vector.load %arg5[%c0_7, %c0_8] : memref<32x1xf32, #tpu.memory_space<vmem>>, vector<32x1xf32>
    %cst_9 = arith.constant dense<0.000000e+00> : vector<32x8xf32>
    %9 = tpu.matmul %7, %6, %cst_9 {dimension_numbers = #tpu.dot_dimension_numbers<[1], [0], [0], [1], [0, 0, 1, 1], [], []>} : vector<32x32xf32>, vector<32x8xf32>, vector<32x8xf32> -> vector<32x8xf32>
    %10 = vector.broadcast %8 : vector<32x1xf32> to vector<32x8xf32>
    %11 = arith.addf %9, %10 : vector<32x8xf32>
    %12 = math.tanh %11 : vector<32x8xf32>
    %c0_10 = arith.constant 0 : index
    %c0_11 = arith.constant 0 : index
    %13 = vector.load %arg6[%c0_10, %c0_11] : memref<4x32xf32, #tpu.memory_space<vmem>>, vector<4x32xf32>
    %c0_12 = arith.constant 0 : index
    %c0_13 = arith.constant 0 : index
    %14 = vector.load %arg7[%c0_12, %c0_13] : memref<4x1xf32, #tpu.memory_space<vmem>>, vector<4x1xf32>
    %cst_14 = arith.constant dense<0.000000e+00> : vector<4x8xf32>
    %15 = tpu.matmul %13, %12, %cst_14 {dimension_numbers = #tpu.dot_dimension_numbers<[1], [0], [0], [1], [0, 0, 1, 1], [], []>} : vector<4x32xf32>, vector<32x8xf32>, vector<4x8xf32> -> vector<4x8xf32>
    %16 = vector.broadcast %14 : vector<4x1xf32> to vector<4x8xf32>
    %17 = arith.addf %15, %16 : vector<4x8xf32>
    %c0_15 = arith.constant 0 : index
    %c0_16 = arith.constant 0 : index
    %18 = vector.load %arg8[%c0_15, %c0_16] : memref<4x8xf32, #tpu.memory_space<vmem>>, vector<4x8xf32>
    tpu.vector_store %arg8[%c0_15, %c0_16], %17 {strides = array<i32>} : memref<4x8xf32, #tpu.memory_space<vmem>>, vector<4x8xf32>,
    return
  }
  func.func @transform_0(%arg0: i32) -> (i32, i32) {
    %c0_i32 = arith.constant 0 : i32
    %c0_i32_0 = arith.constant 0 : i32
    return %arg0, %c0_i32 : i32, i32
  }
  func.func @transform_1(%arg0: i32) -> (i32, i32) {
    %c0_i32 = arith.constant 0 : i32
    %c0_i32_0 = arith.constant 0 : i32
    %c0_i32_1 = arith.constant 0 : i32
    return %c0_i32, %c0_i32_0 : i32, i32
  }
  func.func @transform_2(%arg0: i32) -> (i32, i32) {
    %c0_i32 = arith.constant 0 : i32
    %c0_i32_0 = arith.constant 0 : i32
    %c0_i32_1 = arith.constant 0 : i32
    return %c0_i32, %c0_i32_0 : i32, i32
  }
  func.func @transform_3(%arg0: i32) -> (i32, i32) {
    %c0_i32 = arith.constant 0 : i32
    %c0_i32_0 = arith.constant 0 : i32
    %c0_i32_1 = arith.constant 0 : i32
    return %c0_i32, %c0_i32_0 : i32, i32
  }
  func.func @transform_4(%arg0: i32) -> (i32, i32) {
    %c0_i32 = arith.constant 0 : i32
    %c0_i32_0 = arith.constant 0 : i32
    %c0_i32_1 = arith.constant 0 : i32
    return %c0_i32, %c0_i32_0 : i32, i32
  }
  func.func @transform_5(%arg0: i32) -> (i32, i32) {
    %c0_i32 = arith.constant 0 : i32
    %c0_i32_0 = arith.constant 0 : i32
    %c0_i32_1 = arith.constant 0 : i32
    return %c0_i32, %c0_i32_0 : i32, i32
  }
  func.func @transform_6(%arg0: i32) -> (i32, i32) {
    %c0_i32 = arith.constant 0 : i32
    %c0_i32_0 = arith.constant 0 : i32
    %c0_i32_1 = arith.constant 0 : i32
    return %c0_i32, %c0_i32_0 : i32, i32
  }
  func.func @transform_7(%arg0: i32) -> (i32, i32) {
    %c0_i32 = arith.constant 0 : i32
    %c0_i32_0 = arith.constant 0 : i32
    return %c0_i32, %arg0 : i32, i32
  }
}

</mosaic_0001>

<bundles_post_ra>
// kernel: tpu_custom_call.1
= control target key start
LH: loop header
LB: loop body
LE: loop exit
PB: predicated region body
PF: predicated region fallthrough
CT: control target
= control target key end

     0   :  { %vm56_vm0 = vcmask 130048   ;;  %v492_v4 = vmov 0   ;;  %s607_s0 = inlined_call_operand.vmem [shape: f32[8,16], index: 0, kind: input, shape index: {}]   ;;  %s608_s1 = inlined_call_operand.vmem [shape: f32[32,16], index: 1, kind: input, shape index: {}]   ;;  %s609_s2 = inlined_call_operand.vmem [shape: f32[32,1], index: 2, kind: input, shape index: {}]   ;;  %s610_s3 = inlined_call_operand.vmem [shape: f32[32,32], index: 3, kind: input, shape index: {}]   ;;  %s611_s4 = inlined_call_operand.vmem [shape: f32[32,1], index: 4, kind: input, shape index: {}]   ;;  %s612_s5 = inlined_call_operand.vmem [shape: f32[4,32], index: 5, kind: input, shape index: {}]   ;;  %s613_s6 = inlined_call_operand.vmem [shape: f32[4,1], index: 6, kind: input, shape index: {}]   ;;  %s614_s7 = inlined_call_operand.hbm [shape: f32[4,8], index: 7, kind: output, shape index: {}]  }
   0x1   :  { %v27_v0 = vld [vmem:[%s607_s0] sm:$0xff]  ;;  %v35_v2 = vld [vmem:[%s609_s2 + $0x18] sm:$0xff]  ;;  %v29_v3 = vld [vmem:[%s608_s1 + $0x8] sm:$0xff]  ;;  %452 = vset.pattern.permute.xlu0 %v492_v4  ;;  %453 = vset.pattern.permute.xlu1 %v492_v4 }
   0x2   :  { %v28_v1 = vld [vmem:[%s608_s1] sm:$0xff]  ;;  %415 = vmatprep.subr.msk.mxu0 %vm56_vm0, %v27_v0  ;;  %v33_v5 = vld [vmem:[%s609_s2 + $0x8] sm:$0xff]  ;;  %v30_v6 = vld [vmem:[%s608_s1 + $0x10] sm:$0xff]  ;;  %53 = vperm.xlu0 %452, %v35_v2  }
   0x3   :  { %417 = vmatprep.mubr.msk.f32.mxu0 %vm56_vm0, %v28_v1  ;;  %416 = vmatpush3.xpose.msk.msra.mxu0 %vm56_vm0, %v27_v0  ;;  %v34_v7 = vld [vmem:[%s609_s2 + $0x10] sm:$0xff] }
   0x4   :  { %43 = vperm.xlu1 %453, %v33_v5  }
   0x5   :  { %12 = vsyncpa [#allocation3], 0  ;;  %v32_v8 = vld [vmem:[%s609_s2] sm:$0xff]  ;;  %v31_v9 = vld [vmem:[%s608_s1 + $0x18] sm:$0xff]  ;;  %vm189_vm1 = vcmask 261120   ;;  %v493_v35 = vmov 0.0  }
   0x6   :  { %418 = vmatmul.mubr.msk.f32.vlgmr.msra.gmra.mxu0 %vm56_vm0, %v29_v3  ;;  %48 = vperm.xlu0 %452, %v34_v7   ;;  %v168_v10 = vld [vmem:[%s611_s4 + $0x18] sm:$0xff]  ;;  %v167_v11 = vld [vmem:[%s611_s4 + $0x10] sm:$0xff]  ;;  %v166_v12 = vld [vmem:[%s611_s4 + $0x8] sm:$0xff]  ;;  %vm494_vm2 = vmmov 0   ;;  %s495_s9 = smov [#allocation2]   ;;  %vm371_vm3 = vcmask 60416  }
   0x7   :  { %420 = vmatprep.mubr.msk.f32.mxu0 %vm56_vm0, %v30_v6  ;;  %v165_v13 = vld [vmem:[%s611_s4] sm:$0xff]  ;;  %v162_v32 = vld [vmem:[%s610_s3 + $0x8] sm:$0xff]  ;;  %v163_v33 = vld [vmem:[%s610_s3 + $0x10] sm:$0xff]  ;;  %437 = vmatprep.subr.mxu0 %v493_v35  ;;  %s379_s10 = sshll.u32 %s495_s9, 4  ;;  %s380_s10 = int_to_ptr.vmem [resolvable:$true] %s379_s10 }
   0x8   :  { %38 = vperm.xlu1 %453, %v32_v8   ;;  %v292_v14 = vld [vmem:[%s613_s6] sm:$0xf]  ;;  %v164_v34 = vld [vmem:[%s610_s3 + $0x18] sm:$0xff]  ;;  %s470_s11 = scalar_lea.vmem %s380_s10, 64  ;;  %p475_p1 = scmp.lt.s32.totalorder %s380_s10, %s380_s10 }
   0x9   :  { %v161_v15 = vld [vmem:[%s610_s3] sm:$0xff]  ;;  %p471_p0 = scmp.ne.s32.totalorder %s380_s10, %s470_s11  ;;  %p476_p2 = scmp.lt.s32.totalorder %s470_s11, %s470_s11 }
   0xa   :  { %421 = vmatmul.mubr.msk.f32.gmra.mxu0 %vm56_vm0, %v31_v9  ;;  %186 = vperm.xlu0 %452, %v168_v10   ;;  %v291_v51 = vld [vmem:[%s612_s5] sm:$0xf] }
   0xb   :  { %431 = vmatprep.mubr.msk.f32.mxu1 %vm189_vm1, %v161_v15  ;;  %445 = vmatprep.mubr.msk.f32.mxu0 %vm494_vm2, %v493_v35  ;;  %p477_p3 = por %p476_p2, %p475_p1 }
   0xc   :  { %181 = vperm.xlu1 %453, %v167_v11  }
   0xd   :  { %p478_p4 = pnand %p477_p3, %p471_p0 }
   0xe   :  { %176 = vperm.xlu0 %452, %v166_v12  }
  0x10   :  { %171 = vperm.xlu1 %453, %v165_v13  }
  0x12   :  { %295 = vperm.xlu0 %452, %v292_v14  }
  0x7d   :  { %v54_v16 = vpop.permute.xlu0 %53 }
  0x7f   :  { %v44_v18 = vpop.permute.xlu1 %43 }
  0x81   :  { %v49_v22 = vpop.permute.xlu0 %48 }
  0x83   :  { %v39_v26 = vpop.permute.xlu1 %38 }
  0x85   :  { %v187_v36 = vpop.permute.xlu0 %186 }
  0x87   :  { %v182_v38 = vpop.permute.xlu1 %181 }
  0x89   :  { %v177_v42 = vpop.permute.xlu0 %176 }
  0x8b   :  { %v172_v46 = vpop.permute.xlu1 %171 }
  0x8d   :  { %v296_v53 = vpop.permute.xlu0 %295 }
  0xc6   :  { %v419_v17 = vpop.f32.mrf.mxu0 }
  0xc7   :  { %v144_v24 = vadd.f32 %v419_v17, %v44_v18 }
  0xc8   :  { %v138_v19 = vpop.f32.mrf.mxu0 }
  0xc9   :  { %v139_v27 = vadd.f32 %v138_v19, %v39_v26 }
  0xca   :  { %v422_v20 = vpop.f32.mrf.mxu0 }
  0xcb   :  { %v154_v21 = vadd.f32 %v422_v20, %v54_v16 }
  0xcc   :  { %v148_v23 = vpop.f32.mrf.mxu0 }
  0xcd   :  { %454 = vtanh.f32 %v154_v21  ;;  %v149_v25 = vadd.f32 %v148_v23, %v49_v22 }
  0xcf   :  { %456 = vtanh.f32 %v149_v25 }
  0xd0   :  { %458 = vtanh.f32 %v144_v24 }
  0xd1   :  { %460 = vtanh.f32 %v139_v27 }
  0xda   :  { %v455_v28 = vpop.eup %454 }
  0xdb   :  { %423 = vmatprep.subr.mxu1 %v455_v28 }
  0xdc   :  { %v457_v29 = vpop.eup %456  ;;  %424 = vmatpush3.msra.mxu1 %v455_v28 }
  0xdd   :  { %425 = vmatprep.subr.mxu1 %v457_v29  ;;  %v459_v30 = vpop.eup %458 }
  0xde   :  { %426 = vmatpush3.msra.mxu1 %v457_v29  ;;  %v461_v31 = vpop.eup %460 }
  0xdf   :  { %427 = vmatprep.subr.mxu1 %v459_v30 }
  0xe0   :  { %428 = vmatpush3.msra.mxu1 %v459_v30 }
  0xe1   :  { %429 = vmatprep.subr.mxu1 %v461_v31 }
  0xe2   :  { %430 = vmatpush3.msra.mxu1 %v461_v31 }
  0xe3   :  { %432 = vmatmul.mubr.msk.f32.vlgmr.msra.gmra.mxu1 %vm189_vm1, %v162_v32 }
  0xe4   :  { %434 = vmatprep.mubr.msk.f32.mxu1 %vm189_vm1, %v163_v33 }
  0xe7   :  { %435 = vmatmul.mubr.msk.f32.gmra.mxu1 %vm189_vm1, %v164_v34 }
 0x1a3   :  { %v433_v37 = vpop.f32.mrf.mxu1 }
 0x1a4   :  { %v274_v44 = vadd.f32 %v433_v37, %v177_v42 }
 0x1a5   :  { %v268_v39 = vpop.f32.mrf.mxu1 }
 0x1a6   :  { %v269_v47 = vadd.f32 %v268_v39, %v172_v46 }
 0x1a7   :  { %v436_v40 = vpop.f32.mrf.mxu1 }
 0x1a8   :  { %v284_v41 = vadd.f32 %v436_v40, %v187_v36 }
 0x1a9   :  { %v278_v43 = vpop.f32.mrf.mxu1 }
 0x1aa   :  { %462 = vtanh.f32 %v284_v41  ;;  %v279_v45 = vadd.f32 %v278_v43, %v182_v38 }
 0x1ac   :  { %464 = vtanh.f32 %v279_v45 }
 0x1ad   :  { %466 = vtanh.f32 %v274_v44 }
 0x1ae   :  { %468 = vtanh.f32 %v269_v47 }
 0x1b7   :  { %v463_v48 = vpop.eup %462 }
 0x1b8   :  { %438 = vmatpush3.msra.mxu0 %v463_v48 }
 0x1b9   :  { %v465_v49 = vpop.eup %464  ;;  %439 = vmatprep.subr.mxu0 %v493_v35 }
 0x1ba   :  { %440 = vmatpush3.msra.mxu0 %v465_v49  ;;  %v467_v50 = vpop.eup %466 }
 0x1bb   :  { %441 = vmatprep.subr.mxu0 %v493_v35  ;;  %v469_v52 = vpop.eup %468 }
 0x1bc   :  { %442 = vmatpush3.msra.mxu0 %v467_v50 }
 0x1bd   :  { %443 = vmatprep.subr.mxu0 %v493_v35 }
 0x1be   :  { %444 = vmatpush3.msra.mxu0 %v469_v52 }
 0x1bf   :  { %446 = vmatmul.mubr.msk.f32.vlgmr.msra.gmra.mxu0 %vm189_vm1, %v291_v51 }
 0x27f   :  { %v367_v54 = vpop.f32.mrf.mxu0 }
 0x280   :  { %v368_v55 = vadd.f32 %v367_v54, %v296_v53 }
 0x281   :  { %v447_v56 = vpop.f32.mrf.mxu0 }
 0x282   :  { %372 = vst.msk [vmem:[#allocation2] sm:$0xf] %vm371_vm3, %v368_v55 }
 0x283   :  { %481 = shalt.err (!%p478_p4)
}
 0x284   :  { %382 = dma.vmem_to_hbm [thread:$0]  %s380_s10, 64, %s614_s7, [#allocation3]  }
 0x285   :  { %490 = dma.done.wait [#allocation3], 64  }
 0x286   :  { %491 = vsyncadd [#allocation3], 4294967232 }
 0x287   :  { %386 = vsyncpa [#allocation3], 1 }

</bundles_post_ra>
